<compile_context>
chip_gen: v5e
topology: v5e:2x2
jax: 0.10.0
libtpu: 0.0.40
codegen_flags: <defaults>
</compile_context>

<pallas_src>
import functools

import jax
import jax.numpy as jnp
import numpy as np
from jax.experimental import pallas as pl
from jax.experimental.pallas import tpu as pltpu

EPS = 1e-6
MOMENTUM1 = 0.99
PROB = 0.5  # stochastic gate probability (handled by the caller)


# ------------------------------ VMEM-aware sizing ------------------------------
@functools.lru_cache(maxsize=None)
def _vmem_capacity_bytes():
    try:
        info = pltpu.get_tpu_info()
        cap = getattr(info, "vmem_capacity_bytes", None)
        if cap:
            return int(cap)
    except Exception:
        pass
    return 64 << 20  # conservative fallback = v7x per-TC VMEM


@functools.lru_cache(maxsize=None)
def _budgets():
    cap = _vmem_capacity_bytes()
    # v7x (64 MiB): limit 48 MiB; v5e/v6e (128 MiB): limit 96 MiB.
    vmem_limit = min((cap * 3) // 4, 100 << 20)
    # Apply kernel holds ~4x block (double-buffered in + out) -> ~8 MiB (v7x) / 16 MiB blocks.
    apply_block = max(vmem_limit // 6, 2 << 20)
    # Stats kernel holds ~2x block (double-buffered input; outputs are tiny).
    stats_block = max(min(vmem_limit // 4, 16 << 20), 2 << 20)
    # Fused path: whole x (+ f32 working set + output) must fit comfortably.
    fused_max_x = min(cap // 8, 8 << 20)
    return vmem_limit, apply_block, stats_block, fused_max_x


def _round_up(n, m):
    return ((n + m - 1) // m) * m


def _pick_tile(n, align, max_tile, min_blocks=1):
    """Largest multiple-of-`align` divisor of `n` that is <= max_tile and (when
    possible) leaves at least `min_blocks` grid blocks. `n` must be a multiple
    of `align` (fallback is `align` itself)."""
    best = align
    d = align
    while d <= n:
        if n % d == 0 and d <= max_tile and (n // d) >= min_blocks:
            best = d
        d += align
    return best


# --------------------------- Kernel 1: spatial stats ---------------------------
def _make_stats_kernel(n_valid, eps):
    inv_n = 1.0 / float(n_valid)
    inv_nm1 = 1.0 / float(max(n_valid - 1, 1))

    def kernel(x_ref, out_ref):
        # Grid: (rows_parallel, hw_reduction).  out block (TR, 2) is resident
        # across the hw axis and used as the sum / sumsq accumulator.
        h = pl.program_id(1)

        @pl.when(h == 0)
        def _init():
            out_ref[...] = jnp.zeros_like(out_ref)

        x = x_ref[...].astype(jnp.float32)                 # (TR, THW)
        s = jnp.sum(x, axis=1, keepdims=True)              # (TR, 1)
        sq = jnp.sum(x * x, axis=1, keepdims=True)         # (TR, 1)
        out_ref[...] += jnp.concatenate([s, sq], axis=1)   # (TR, 2)

        @pl.when(h == pl.num_programs(1) - 1)
        def _finalize():
            acc = out_ref[...]
            s_tot = acc[:, 0:1]
            sq_tot = acc[:, 1:2]
            mean = s_tot * inv_n
            # Clamp: single-pass var can go slightly negative from cancellation.
            var = jnp.maximum(sq_tot - mean * s_tot, 0.0) * inv_nm1
            std = jnp.sqrt(var + eps)
            out_ref[...] = jnp.concatenate([mean, std], axis=1)

    return kernel


def ffa_stats(x2p, n_valid, eps=EPS, block_budget_bytes=None):
    """x2p: (R_pad, HW_pad), zero-padded to multiples of (8, 128).
    n_valid: true H*W (padding columns are zeros -> sums unaffected).
    Returns (R_pad, 2) float32: [:, 0] = mean, [:, 1] = std (unbiased)."""
    R_pad, HW_pad = x2p.shape
    vmem_limit, _, stats_budget, _ = _budgets()
    budget = block_budget_bytes or stats_budget
    itemsize = x2p.dtype.itemsize

    tr = _pick_tile(R_pad, 8, max(budget // (HW_pad * itemsize), 8), min_blocks=2)
    thw = _pick_tile(HW_pad, 128, max(budget // (tr * itemsize), 128))
    grid = (R_pad // tr, HW_pad // thw)

    return pl.pallas_call(
        _make_stats_kernel(n_valid, eps),
        out_shape=jax.ShapeDtypeStruct((R_pad, 2), jnp.float32),
        grid=grid,
        in_specs=[pl.BlockSpec((tr, thw), lambda r, h: (r, h))],
        out_specs=pl.BlockSpec((tr, 2), lambda r, h: (r, 0)),
        compiler_params=pltpu.CompilerParams(
            dimension_semantics=("parallel", "arbitrary"),
            vmem_limit_bytes=vmem_limit),
    )(x2p)


# ------------------------ Kernel 2: streaming normalize ------------------------
def _apply_kernel(x_ref, ss_ref, y_ref):
    # Pure FMA hot loop: y = x * scale + shift (scale/shift broadcast over lanes).
    x = x_ref[...].astype(jnp.float32)                 # (TR, THW)
    ss = ss_ref[...]                                   # (TR, 2): [scale, shift]
    y_ref[...] = (x * ss[:, 0:1] + ss[:, 1:2]).astype(y_ref.dtype)


def ffa_apply(x2p, ss_pad, donate_x=False, block_budget_bytes=None):
    """x2p: (R_pad, HW_pad); ss_pad: (R_pad, 2) f32 with [:,0]=scale, [:,1]=shift.
    donate_x=True aliases x2p -> y (caller must not reuse x2p afterwards)."""
    R_pad, HW_pad = x2p.shape
    vmem_limit, apply_budget, _, _ = _budgets()
    budget = block_budget_bytes or apply_budget
    itemsize = x2p.dtype.itemsize

    tr = _pick_tile(R_pad, 8, max(budget // (HW_pad * itemsize), 8), min_blocks=2)
    hw_min_blocks = 2 if (R_pad // tr) < 2 else 1       # keep both v7x TCs busy
    thw = _pick_tile(HW_pad, 128, max(budget // (tr * itemsize), 128),
                     min_blocks=hw_min_blocks)
    grid = (R_pad // tr, HW_pad // thw)

    return pl.pallas_call(
        _apply_kernel,
        out_shape=jax.ShapeDtypeStruct((R_pad, HW_pad), x2p.dtype),
        grid=grid,
        in_specs=[pl.BlockSpec((tr, thw), lambda r, h: (r, h)),
                  pl.BlockSpec((tr, 2), lambda r, h: (r, 0))],
        out_specs=pl.BlockSpec((tr, thw), lambda r, h: (r, h)),
        compiler_params=pltpu.CompilerParams(
            dimension_semantics=("parallel", "parallel"),
            vmem_limit_bytes=vmem_limit),
        input_output_aliases=({0: 0} if donate_x else {}),
    )(x2p, ss_pad)


# ------------------- Fused single-call fast path (small inputs) -------------------
def _make_fused_kernel(B, C, n_spatial, eps):
    inv_n = 1.0 / float(n_spatial)
    inv_nm1 = 1.0 / float(max(n_spatial - 1, 1))
    inv_bm1 = 1.0 / float(max(B - 1, 1))

    def kernel(x_ref, nb_ref, ng_ref, rvm_ref, rvs_ref, y_ref, stats_ref):
        x = x_ref[...].astype(jnp.float32)                      # (B, C, HW)

        # Per-(b, c) spatial stats (single pass, clamped variance).
        s = jnp.sum(x, axis=-1, keepdims=True)                  # (B, C, 1)
        sq = jnp.sum(x * x, axis=-1, keepdims=True)
        mean = s * inv_n
        var = jnp.maximum(sq - mean * s, 0.0) * inv_nm1
        std = jnp.sqrt(var + eps)                                # (B, C, 1)

        # Cross-batch (unbiased) variance of the per-sample statistics.
        mu_m = jnp.mean(mean, axis=0, keepdims=True)             # (1, C, 1)
        var_mu = jnp.sum((mean - mu_m) ** 2, axis=0, keepdims=True) * inv_bm1 + eps
        mu_s = jnp.mean(std, axis=0, keepdims=True)
        var_std = jnp.sum((std - mu_s) ** 2, axis=0, keepdims=True) * inv_bm1 + eps

        r1 = 1.0 / (1.0 + 1.0 / (rvm_ref[...] + eps))            # (1, C, 1)
        gamma_mu = (float(C) * r1) / jnp.sum(r1)
        r2 = 1.0 / (1.0 + 1.0 / (rvs_ref[...] + eps))
        gamma_std = (float(C) * r2) / jnp.sum(r2)

        var_mu = jnp.sqrt((gamma_mu + 1.0) * var_mu)              # (1, C, 1)
        var_std = jnp.sqrt((gamma_std + 1.0) * var_std)

        beta = nb_ref[...] * var_mu + mean                        # (B, C, 1)
        gamma = ng_ref[...] * var_std + std

        # y = (x - mean)/std * gamma + beta  ==  x*scale + shift
        scale = gamma / std
        shift = beta - mean * scale
        y_ref[...] = (x * scale + shift).astype(y_ref.dtype)

        stats_ref[0] = mean
        stats_ref[1] = std

    return kernel


def ffa_fused(x3, noise_beta, noise_gamma, running_var_mean, running_var_std, eps=EPS):
    """x3: (B, C, HW) small enough to sit in VMEM.  One HBM read + one write.
    Returns (y3, mean, std) with mean/std shaped (B, C), float32."""
    B, C, HW = x3.shape
    vmem_limit, _, _, _ = _budgets()
    y3, stats = pl.pallas_call(
        _make_fused_kernel(B, C, HW, eps),
        out_shape=(jax.ShapeDtypeStruct((B, C, HW), x3.dtype),
                   jax.ShapeDtypeStruct((2, B, C, 1), jnp.float32)),
        compiler_params=pltpu.CompilerParams(vmem_limit_bytes=vmem_limit),
    )(x3,
      noise_beta.reshape(B, C, 1).astype(jnp.float32),
      noise_gamma.reshape(B, C, 1).astype(jnp.float32),
      running_var_mean.reshape(1, C, 1).astype(jnp.float32),
      running_var_std.reshape(1, C, 1).astype(jnp.float32))
    return y3, stats[0, :, :, 0], stats[1, :, :, 0]


# -------------------------------- Forward wrapper -------------------------------
def ffa_forward(x, running_var_mean, running_var_std, running_mean, running_std,
                noise_beta, noise_gamma, momentum1=MOMENTUM1, eps=EPS,
                use_fused=None, donate_x=False):
    """Active (training, gate-taken) branch of FFALayer.forward.

    Requires B >= 2 and H*W >= 2 (unbiased variances), like the PyTorch module.
    Returns (y, new_running_mean_bmic, new_running_std_bmic)."""
    B, C, H, W = x.shape
    assert B >= 2 and H * W >= 2, "FFALayer needs batch >= 2 and H*W >= 2"
    HW = H * W
    R = B * C
    _, _, _, fused_max_x = _budgets()

    if use_fused is None:
        use_fused = (R * HW * x.dtype.itemsize) <= fused_max_x

    if use_fused:
        y3, mean, std = ffa_fused(x.reshape(B, C, HW), noise_beta, noise_gamma,
                                  running_var_mean, running_var_std, eps)
        new_rm = running_mean * momentum1 + jnp.mean(mean, axis=0) * (1 - momentum1)
        new_rs = running_std * momentum1 + jnp.mean(std, axis=0) * (1 - momentum1)
        return y3.reshape(B, C, H, W), new_rm, new_rs

    # ---------------- tiled two-pass path (large activations) ----------------
    x2 = x.reshape(R, HW)                                  # lane-dense view
    R_pad = _round_up(R, 8)
    HW_pad = _round_up(HW, 128)
    if (R_pad, HW_pad) != (R, HW):
        x2p = jnp.pad(x2, ((0, R_pad - R), (0, HW_pad - HW)))   # zeros: stats-exact
    else:
        x2p = x2

    # --- heavy spatial reduction (Pallas kernel 1) ---
    stats = ffa_stats(x2p, n_valid=HW, eps=eps)            # (R_pad, 2) f32
    mean = stats[:R, 0].reshape(B, C)
    std = stats[:R, 1].reshape(B, C)

    # --- momentum_updating_running_mean_and_std ---
    new_rm = running_mean * momentum1 + jnp.mean(mean, axis=0) * (1 - momentum1)
    new_rs = running_std * momentum1 + jnp.mean(std, axis=0) * (1 - momentum1)

    # --- tiny O(B*C) cross-batch statistics, hoisted out of the apply kernel ---
    var_mu = jnp.var(mean, axis=0, ddof=1) + eps           # (C,)
    var_std = jnp.var(std, axis=0, ddof=1) + eps
    r1 = 1.0 / (1.0 + 1.0 / (running_var_mean + eps))
    gamma_mu = C * r1 / jnp.sum(r1)
    r2 = 1.0 / (1.0 + 1.0 / (running_var_std + eps))
    gamma_std = C * r2 / jnp.sum(r2)
    var_mu = jnp.sqrt((gamma_mu + 1.0) * var_mu)[None, :]  # (1, C)
    var_std = jnp.sqrt((gamma_std + 1.0) * var_std)[None, :]

    beta = noise_beta * var_mu + mean                      # (B, C)
    gamma = noise_gamma * var_std + std

    # Fold normalize + affine into one per-row FMA.
    scale = (gamma / std).astype(jnp.float32)              # (B, C)
    shift = (beta - mean * scale).astype(jnp.float32)
    ss = jnp.stack([scale.reshape(R), shift.reshape(R)], axis=1)   # (R, 2)
    if R_pad != R:
        ss = jnp.pad(ss, ((0, R_pad - R), (0, 0)))

    # --- streaming elementwise transform (Pallas kernel 2) ---
    y2p = ffa_apply(x2p, ss, donate_x=donate_x)
    y = y2p[:R, :HW].reshape(B, C, H, W)
    return y, new_rm, new_rs


# ------------------------------- Pure-JAX reference ------------------------------
def ffa_reference(x, rvm, rvs, noise_beta, noise_gamma, eps=EPS):
    B, C, H, W = x.shape
    mean = jnp.mean(x, axis=(2, 3))                              # (B, C)
    std = jnp.sqrt(jnp.var(x, axis=(2, 3), ddof=1) + eps)        # (B, C)
    var_mu = jnp.var(mean, axis=0, ddof=1) + eps                 # (C,)
    var_std = jnp.var(std, axis=0, ddof=1) + eps
    r1 = 1.0 / (1.0 + 1.0 / (rvm + eps))
    g_mu = C * r1 / jnp.sum(r1)
    r2 = 1.0 / (1.0 + 1.0 / (rvs + eps))
    g_std = C * r2 / jnp.sum(r2)
    var_mu = jnp.sqrt((g_mu + 1.0) * var_mu)[None, :]            # (1, C)
    var_std = jnp.sqrt((g_std + 1.0) * var_std)[None, :]
    beta = noise_beta * var_mu + mean                            # (B, C)
    gamma = noise_gamma * var_std + std
    xn = (x - mean[:, :, None, None]) / std[:, :, None, None]
    return xn * gamma[:, :, None, None] + beta[:, :, None, None]


if __name__ == "__main__":
    key = jax.random.PRNGKey(0)
    k1, k2, k3, k4, k5, k6, k7, k8 = jax.random.split(key, 8)

    # ------------- Test 1: demo shape (2,4,16,16), auto (fused) path -------------
    B, C, H, W = 2, 4, 16, 16
    x = jax.random.normal(k1, (B, C, H, W), jnp.float32)
    running_var_mean_bmic = jnp.ones((C,), jnp.float32)
    running_var_std_bmic = jnp.ones((C,), jnp.float32)
    running_mean_bmic = jnp.zeros((C,), jnp.float32)
    running_std_bmic = jnp.ones((C,), jnp.float32)
    noise_beta = jax.random.normal(k2, (B, C), jnp.float32)
    noise_gamma = jax.random.normal(k3, (B, C), jnp.float32)

    y, new_rm, new_rs = ffa_forward(x, running_var_mean_bmic, running_var_std_bmic,
                                    running_mean_bmic, running_std_bmic,
                                    noise_beta, noise_gamma)
    jax.block_until_ready(y)
    y_ref = ffa_reference(x, running_var_mean_bmic, running_var_std_bmic,
                          noise_beta, noise_gamma)
    np.testing.assert_allclose(np.asarray(y), np.asarray(y_ref), rtol=1e-4, atol=1e-4)

    mean_ref = jnp.mean(x, axis=(2, 3))
    std_ref = jnp.sqrt(jnp.var(x, axis=(2, 3), ddof=1) + EPS)
    rm_ref = running_mean_bmic * MOMENTUM1 + jnp.mean(mean_ref, axis=0) * (1 - MOMENTUM1)
    rs_ref = running_std_bmic * MOMENTUM1 + jnp.mean(std_ref, axis=0) * (1 - MOMENTUM1)
    np.testing.assert_allclose(np.asarray(new_rm), np.asarray(rm_ref), rtol=1e-5, atol=1e-5)
    np.testing.assert_allclose(np.asarray(new_rs), np.asarray(rs_ref), rtol=1e-5, atol=1e-5)

    # ------------- Test 2: same inputs, forced tiled two-kernel path -------------
    y_t, _, _ = ffa_forward(x, running_var_mean_bmic, running_var_std_bmic,
                            running_mean_bmic, running_std_bmic,
                            noise_beta, noise_gamma, use_fused=False)
    jax.block_until_ready(y_t)
    np.testing.assert_allclose(np.asarray(y_t), np.asarray(y_ref), rtol=1e-4, atol=1e-4)

    # ------- Test 3: awkward (non-8/128-divisible) shape, padding + both paths -------
    B3, C3, H3, W3 = 3, 5, 10, 10
    x3 = jax.random.normal(k4, (B3, C3, H3, W3), jnp.float32)
    rvm3 = jnp.abs(jax.random.normal(k5, (C3,), jnp.float32)) + 0.5
    rvs3 = jnp.abs(jax.random.normal(k6, (C3,), jnp.float32)) + 0.5
    nb3 = jax.random.normal(k7, (B3, C3), jnp.float32)
    ng3 = jax.random.normal(k8, (B3, C3), jnp.float32)
    y3_ref = ffa_reference(x3, rvm3, rvs3, nb3, ng3)

    y3_t, _, _ = ffa_forward(x3, rvm3, rvs3, jnp.zeros((C3,), jnp.float32),
                             jnp.ones((C3,), jnp.float32), nb3, ng3, use_fused=False)
    jax.block_until_ready(y3_t)
    np.testing.assert_allclose(np.asarray(y3_t), np.asarray(y3_ref), rtol=1e-4, atol=1e-4)

    y3_f, _, _ = ffa_forward(x3, rvm3, rvs3, jnp.zeros((C3,), jnp.float32),
                             jnp.ones((C3,), jnp.float32), nb3, ng3, use_fused=True)
    np.testing.assert_allclose(np.asarray(y3_f), np.asarray(y3_ref), rtol=1e-4, atol=1e-4)

    # ------- Test 4: multi-block grids (tiny forced block budget, exercises the
    #                 multi-step HW reduction axis and 2-D apply grid) -------
    R4, HW4 = 16, 1024
    x4 = jax.random.normal(k1, (R4, HW4), jnp.float32)
    st4 = ffa_stats(x4, n_valid=HW4, block_budget_bytes=8 * 128 * 4)    # grid (2, 8)
    np.testing.assert_allclose(np.asarray(st4[:, 0]),
                               np.asarray(jnp.mean(x4, axis=1)), rtol=1e-5, atol=1e-5)
    np.testing.assert_allclose(np.asarray(st4[:, 1]),
                               np.asarray(jnp.sqrt(jnp.var(x4, axis=1, ddof=1) + EPS)),
                               rtol=1e-4, atol=1e-4)
    sc4 = jax.random.normal(k2, (R4,), jnp.float32)
    sh4 = jax.random.normal(k3, (R4,), jnp.float32)
    y4 = ffa_apply(x4, jnp.stack([sc4, sh4], axis=1),
                   block_budget_bytes=8 * 128 * 4)                      # grid (2, 8)
    np.testing.assert_allclose(np.asarray(y4),
                               np.asarray(x4 * sc4[:, None] + sh4[:, None]),
                               rtol=1e-5, atol=1e-5)

    print("KERNEL_OK")
</pallas_src>

<mosaic_0001>
module attributes {stable_mosaic.version = 11 : i64} {
  func.func @kernel(%arg0: memref<2x4x256xf32, #tpu.memory_space<vmem>>, %arg1: memref<2x4x1xf32, #tpu.memory_space<vmem>>, %arg2: memref<2x4x1xf32, #tpu.memory_space<vmem>>, %arg3: memref<1x4x1xf32, #tpu.memory_space<vmem>>, %arg4: memref<1x4x1xf32, #tpu.memory_space<vmem>>, %arg5: memref<2x4x256xf32, #tpu.memory_space<vmem>>, %arg6: memref<2x2x4x1xf32, #tpu.memory_space<vmem>>) attributes {dimension_semantics = [], scalar_prefetch = 0 : i64, scratch_operands = 0 : i64, tpu.core_type = #tpu.core_type<tc>} {
    %c0 = arith.constant 0 : index
    %c0_0 = arith.constant 0 : index
    %c0_1 = arith.constant 0 : index
    %0 = vector.load %arg0[%c0, %c0_0, %c0_1] : memref<2x4x256xf32, #tpu.memory_space<vmem>>, vector<2x4x256xf32>
    %cst = arith.constant dense<0.000000e+00> : vector<2x4xf32>
    %1 = vector.multi_reduction <add>, %0, %cst [2] : vector<2x4x256xf32> to vector<2x4xf32>
    %2 = vector.shape_cast %1 : vector<2x4xf32> to vector<2x4x1xf32>
    %3 = arith.mulf %0, %0 : vector<2x4x256xf32>
    %cst_2 = arith.constant dense<0.000000e+00> : vector<2x4xf32>
    %4 = vector.multi_reduction <add>, %3, %cst_2 [2] : vector<2x4x256xf32> to vector<2x4xf32>
    %5 = vector.shape_cast %4 : vector<2x4xf32> to vector<2x4x1xf32>
    %cst_3 = arith.constant 3.906250e-03 : f32
    %6 = vector.broadcast %cst_3 : f32 to vector<2x4x1xf32>
    %7 = arith.mulf %2, %6 : vector<2x4x1xf32>
    %8 = arith.mulf %7, %2 : vector<2x4x1xf32>
    %9 = arith.subf %5, %8 : vector<2x4x1xf32>
    %cst_4 = arith.constant 0.000000e+00 : f32
    %10 = vector.broadcast %cst_4 : f32 to vector<2x4x1xf32>
    %11 = arith.maximumf %9, %10 : vector<2x4x1xf32>
    %cst_5 = arith.constant 0.00392156886 : f32
    %12 = vector.broadcast %cst_5 : f32 to vector<2x4x1xf32>
    %13 = arith.mulf %11, %12 : vector<2x4x1xf32>
    %cst_6 = arith.constant 9.99999997E-7 : f32
    %14 = vector.broadcast %cst_6 : f32 to vector<2x4x1xf32>
    %15 = arith.addf %13, %14 : vector<2x4x1xf32>
    %16 = math.sqrt %15 : vector<2x4x1xf32>
    %cst_7 = arith.constant dense<0.000000e+00> : vector<4x1xf32>
    %17 = vector.multi_reduction <add>, %7, %cst_7 [0] : vector<2x4x1xf32> to vector<4x1xf32>
    %18 = vector.shape_cast %17 : vector<4x1xf32> to vector<1x4x1xf32>
    %cst_8 = arith.constant 2.000000e+00 : f32
    %19 = vector.broadcast %cst_8 : f32 to vector<1x4x1xf32>
    %20 = arith.divf %18, %19 : vector<1x4x1xf32>
    %21 = vector.broadcast %20 : vector<1x4x1xf32> to vector<2x4x1xf32>
    %22 = arith.subf %7, %21 : vector<2x4x1xf32>
    %23 = arith.mulf %22, %22 : vector<2x4x1xf32>
    %cst_9 = arith.constant dense<0.000000e+00> : vector<4x1xf32>
    %24 = vector.multi_reduction <add>, %23, %cst_9 [0] : vector<2x4x1xf32> to vector<4x1xf32>
    %25 = vector.shape_cast %24 : vector<4x1xf32> to vector<1x4x1xf32>
    %cst_10 = arith.constant 1.000000e+00 : f32
    %26 = vector.broadcast %cst_10 : f32 to vector<1x4x1xf32>
    %27 = arith.mulf %25, %26 : vector<1x4x1xf32>
    %cst_11 = arith.constant 9.99999997E-7 : f32
    %28 = vector.broadcast %cst_11 : f32 to vector<1x4x1xf32>
    %29 = arith.addf %27, %28 : vector<1x4x1xf32>
    %cst_12 = arith.constant dense<0.000000e+00> : vector<4x1xf32>
    %30 = vector.multi_reduction <add>, %16, %cst_12 [0] : vector<2x4x1xf32> to vector<4x1xf32>
    %31 = vector.shape_cast %30 : vector<4x1xf32> to vector<1x4x1xf32>
    %cst_13 = arith.constant 2.000000e+00 : f32
    %32 = vector.broadcast %cst_13 : f32 to vector<1x4x1xf32>
    %33 = arith.divf %31, %32 : vector<1x4x1xf32>
    %34 = vector.broadcast %33 : vector<1x4x1xf32> to vector<2x4x1xf32>
    %35 = arith.subf %16, %34 : vector<2x4x1xf32>
    %36 = arith.mulf %35, %35 : vector<2x4x1xf32>
    %cst_14 = arith.constant dense<0.000000e+00> : vector<4x1xf32>
    %37 = vector.multi_reduction <add>, %36, %cst_14 [0] : vector<2x4x1xf32> to vector<4x1xf32>
    %38 = vector.shape_cast %37 : vector<4x1xf32> to vector<1x4x1xf32>
    %cst_15 = arith.constant 1.000000e+00 : f32
    %39 = vector.broadcast %cst_15 : f32 to vector<1x4x1xf32>
    %40 = arith.mulf %38, %39 : vector<1x4x1xf32>
    %cst_16 = arith.constant 9.99999997E-7 : f32
    %41 = vector.broadcast %cst_16 : f32 to vector<1x4x1xf32>
    %42 = arith.addf %40, %41 : vector<1x4x1xf32>
    %c0_17 = arith.constant 0 : index
    %c0_18 = arith.constant 0 : index
    %c0_19 = arith.constant 0 : index
    %43 = vector.load %arg3[%c0_17, %c0_18, %c0_19] : memref<1x4x1xf32, #tpu.memory_space<vmem>>, vector<1x4x1xf32>
    %cst_20 = arith.constant 9.99999997E-7 : f32
    %44 = vector.broadcast %cst_20 : f32 to vector<1x4x1xf32>
    %45 = arith.addf %43, %44 : vector<1x4x1xf32>
    %cst_21 = arith.constant 1.000000e+00 : f32
    %46 = vector.broadcast %cst_21 : f32 to vector<1x4x1xf32>
    %47 = arith.divf %46, %45 : vector<1x4x1xf32>
    %cst_22 = arith.constant 1.000000e+00 : f32
    %48 = vector.broadcast %cst_22 : f32 to vector<1x4x1xf32>
    %49 = arith.addf %48, %47 : vector<1x4x1xf32>
    %cst_23 = arith.constant 1.000000e+00 : f32
    %50 = vector.broadcast %cst_23 : f32 to vector<1x4x1xf32>
    %51 = arith.divf %50, %49 : vector<1x4x1xf32>
    %cst_24 = arith.constant 4.000000e+00 : f32
    %52 = vector.broadcast %cst_24 : f32 to vector<1x4x1xf32>
    %53 = arith.mulf %52, %51 : vector<1x4x1xf32>
    %54 = vector.shape_cast %51 : vector<1x4x1xf32> to vector<1x1x4x1xf32>
    %cst_25 = arith.constant dense<0.000000e+00> : vector<1xf32>
    %55 = vector.multi_reduction <add>, %54, %cst_25 [1, 2, 3] : vector<1x1x4x1xf32> to vector<1xf32>
    %56 = vector.shape_cast %55 : vector<1xf32> to vector<1x1x1x1xf32>
    %57 = vector.extract %56[0, 0, 0, 0] : f32 from vector<1x1x1x1xf32>
    %58 = vector.broadcast %57 : f32 to vector<1x4x1xf32>
    %59 = arith.divf %53, %58 : vector<1x4x1xf32>
    %c0_26 = arith.constant 0 : index
    %c0_27 = arith.constant 0 : index
    %c0_28 = arith.constant 0 : index
    %60 = vector.load %arg4[%c0_26, %c0_27, %c0_28] : memref<1x4x1xf32, #tpu.memory_space<vmem>>, vector<1x4x1xf32>
    %cst_29 = arith.constant 9.99999997E-7 : f32
    %61 = vector.broadcast %cst_29 : f32 to vector<1x4x1xf32>
    %62 = arith.addf %60, %61 : vector<1x4x1xf32>
    %cst_30 = arith.constant 1.000000e+00 : f32
    %63 = vector.broadcast %cst_30 : f32 to vector<1x4x1xf32>
    %64 = arith.divf %63, %62 : vector<1x4x1xf32>
    %cst_31 = arith.constant 1.000000e+00 : f32
    %65 = vector.broadcast %cst_31 : f32 to vector<1x4x1xf32>
    %66 = arith.addf %65, %64 : vector<1x4x1xf32>
    %cst_32 = arith.constant 1.000000e+00 : f32
    %67 = vector.broadcast %cst_32 : f32 to vector<1x4x1xf32>
    %68 = arith.divf %67, %66 : vector<1x4x1xf32>
    %cst_33 = arith.constant 4.000000e+00 : f32
    %69 = vector.broadcast %cst_33 : f32 to vector<1x4x1xf32>
    %70 = arith.mulf %69, %68 : vector<1x4x1xf32>
    %71 = vector.shape_cast %68 : vector<1x4x1xf32> to vector<1x1x4x1xf32>
    %cst_34 = arith.constant dense<0.000000e+00> : vector<1xf32>
    %72 = vector.multi_reduction <add>, %71, %cst_34 [1, 2, 3] : vector<1x1x4x1xf32> to vector<1xf32>
    %73 = vector.shape_cast %72 : vector<1xf32> to vector<1x1x1x1xf32>
    %74 = vector.extract %73[0, 0, 0, 0] : f32 from vector<1x1x1x1xf32>
    %75 = vector.broadcast %74 : f32 to vector<1x4x1xf32>
    %76 = arith.divf %70, %75 : vector<1x4x1xf32>
    %cst_35 = arith.constant 1.000000e+00 : f32
    %77 = vector.broadcast %cst_35 : f32 to vector<1x4x1xf32>
    %78 = arith.addf %59, %77 : vector<1x4x1xf32>
    %79 = arith.mulf %78, %29 : vector<1x4x1xf32>
    %80 = math.sqrt %79 : vector<1x4x1xf32>
    %cst_36 = arith.constant 1.000000e+00 : f32
    %81 = vector.broadcast %cst_36 : f32 to vector<1x4x1xf32>
    %82 = arith.addf %76, %81 : vector<1x4x1xf32>
    %83 = arith.mulf %82, %42 : vector<1x4x1xf32>
    %84 = math.sqrt %83 : vector<1x4x1xf32>
    %c0_37 = arith.constant 0 : index
    %c0_38 = arith.constant 0 : index
    %c0_39 = arith.constant 0 : index
    %85 = vector.load %arg1[%c0_37, %c0_38, %c0_39] : memref<2x4x1xf32, #tpu.memory_space<vmem>>, vector<2x4x1xf32>
    %86 = vector.broadcast %80 : vector<1x4x1xf32> to vector<2x4x1xf32>
    %87 = arith.mulf %85, %86 : vector<2x4x1xf32>
    %88 = arith.addf %87, %7 : vector<2x4x1xf32>
    %c0_40 = arith.constant 0 : index
    %c0_41 = arith.constant 0 : index
    %c0_42 = arith.constant 0 : index
    %89 = vector.load %arg2[%c0_40, %c0_41, %c0_42] : memref<2x4x1xf32, #tpu.memory_space<vmem>>, vector<2x4x1xf32>
    %90 = vector.broadcast %84 : vector<1x4x1xf32> to vector<2x4x1xf32>
    %91 = arith.mulf %89, %90 : vector<2x4x1xf32>
    %92 = arith.addf %91, %16 : vector<2x4x1xf32>
    %93 = arith.divf %92, %16 : vector<2x4x1xf32>
    %94 = arith.mulf %7, %93 : vector<2x4x1xf32>
    %95 = arith.subf %88, %94 : vector<2x4x1xf32>
    %96 = vector.broadcast %93 : vector<2x4x1xf32> to vector<2x4x256xf32>
    %97 = arith.mulf %0, %96 : vector<2x4x256xf32>
    %98 = vector.broadcast %95 : vector<2x4x1xf32> to vector<2x4x256xf32>
    %99 = arith.addf %97, %98 : vector<2x4x256xf32>
    %c0_43 = arith.constant 0 : index
    %c0_44 = arith.constant 0 : index
    %c0_45 = arith.constant 0 : index
    %100 = vector.load %arg5[%c0_43, %c0_44, %c0_45] : memref<2x4x256xf32, #tpu.memory_space<vmem>>, vector<2x4x256xf32>
    tpu.vector_store %arg5[%c0_43, %c0_44, %c0_45], %99 {strides = array<i32>} : memref<2x4x256xf32, #tpu.memory_space<vmem>>, vector<2x4x256xf32>,
    %c0_46 = arith.constant 0 : index
    %c0_47 = arith.constant 0 : index
    %c0_48 = arith.constant 0 : index
    %c0_49 = arith.constant 0 : index
    %101 = vector.load %arg6[%c0_46, %c0_47, %c0_48, %c0_49] : memref<2x2x4x1xf32, #tpu.memory_space<vmem>>, vector<1x2x4x1xf32>
    %102 = vector.shape_cast %101 : vector<1x2x4x1xf32> to vector<2x4x1xf32>
    %103 = vector.shape_cast %7 : vector<2x4x1xf32> to vector<1x2x4x1xf32>
    tpu.vector_store %arg6[%c0_46, %c0_47, %c0_48, %c0_49], %103 {strides = array<i32>} : memref<2x2x4x1xf32, #tpu.memory_space<vmem>>, vector<1x2x4x1xf32>,
    %c1 = arith.constant 1 : index
    %c0_50 = arith.constant 0 : index
    %c0_51 = arith.constant 0 : index
    %c0_52 = arith.constant 0 : index
    %104 = vector.load %arg6[%c1, %c0_50, %c0_51, %c0_52] : memref<2x2x4x1xf32, #tpu.memory_space<vmem>>, vector<1x2x4x1xf32>
    %105 = vector.shape_cast %104 : vector<1x2x4x1xf32> to vector<2x4x1xf32>
    %106 = vector.shape_cast %16 : vector<2x4x1xf32> to vector<1x2x4x1xf32>
    tpu.vector_store %arg6[%c1, %c0_50, %c0_51, %c0_52], %106 {strides = array<i32>} : memref<2x2x4x1xf32, #tpu.memory_space<vmem>>, vector<1x2x4x1xf32>,
    return
  }
}

</mosaic_0001>

<bundles_post_ra>
// kernel: tpu_custom_call.1
= control target key start
LH: loop header
LB: loop body
LE: loop exit
PB: predicated region body
PF: predicated region fallthrough
CT: control target
= control target key end

     0   :  { %s687_s0 = inlined_call_operand.vmem [shape: f32[2,4,256], index: 0, kind: input, shape index: {}]   ;;  %s688_s1 = inlined_call_operand.vmem [shape: f32[2,4,1], index: 1, kind: input, shape index: {}]   ;;  %s689_s2 = inlined_call_operand.vmem [shape: f32[2,4,1], index: 2, kind: input, shape index: {}]   ;;  %s690_s3 = inlined_call_operand.vmem [shape: f32[1,4,1], index: 3, kind: input, shape index: {}]   ;;  %s691_s4 = inlined_call_operand.vmem [shape: f32[1,4,1], index: 4, kind: input, shape index: {}]   ;;  %s692_s5 = inlined_call_operand.hbm [shape: f32[2,4,256], index: 5, kind: output, shape index: {0}]   ;;  %s693_s6 = inlined_call_operand.vmem [shape: f32[2,2,4,1], index: 6, kind: output, shape index: {1}]  }
   0x1   :  { %v141_v0 = vld [vmem:[%s690_s3] sm:$0xf] }
   0x2   :  { %v519_v1 = vld [vmem:[%s687_s0] sm:$0xff]  ;;  %v142_v3 = vadd.f32 1e-06, %v141_v0 }
   0x3   :  { %v202_v2 = vld [vmem:[%s691_s4] sm:$0xf]  ;;  %27 = vst [vmem:[#allocation1] ss:$2 sm:$0xff] %v519_v1 }
   0x4   :  { %v203_v4 = vadd.f32 1e-06, %v202_v2 }
   0x5   :  { %12 = vsyncpa [#allocation3], 0  ;;  %420 = vrcp.f32 %v142_v3  ;;  %v528_v5 = vld [vmem:[%s687_s0 + $0x8] sm:$0xff]  ;;  %v49_v6 = vmul.f32 %v519_v1, %v519_v1  ;;  %v152_v7 = vand.u32 2147483647, %v142_v3  ;;  %v154_v8 = vand.u32 2147483648, %v142_v3 }
   0x6   :  { %422 = vrcp.f32 %v203_v4  ;;  %31 = vst [vmem:[#allocation1 + $0x10] ss:$2 sm:$0xff] %v528_v5  ;;  %vm38_vm0 = vcmask 1043456   ;;  %v213_v14 = vand.u32 2147483647, %v203_v4  ;;  %v215_v18 = vand.u32 2147483648, %v203_v4 }
   0x7   :  { %v50_v19 = vmul.f32 %v528_v5, %v528_v5  ;;  %vm148_vm1 = vweird.f32 %v142_v3  ;;  %vm209_vm3 = vweird.f32 %v203_v4  ;;  %vm537_vm5 = vcmp.eq.f32.partialorder %v152_v7, 8.507059e+37  ;;  %s389_s21 = sshll.u32 %s692_s5, 4  ;;  %s476_s22 = smov 128   ;;  %s390_s21 = int_to_ptr.hbm [resolvable:$true] %s389_s21 }
   0x8   :  { %v155_v28 = vor.u32 1.1754944e-38, %v154_v8  ;;  %vm545_vm7 = vcmp.eq.f32.partialorder %v213_v14, 8.507059e+37  ;;  %v216_v31 = vor.u32 1.1754944e-38, %v215_v18  ;;  %vm175_vm15 = vcmask 3072   ;;  %s477_s23 = smov 8  }
   0xa   :  { %v28_v9 = vld.sshfl [vmem:[#allocation1] sm:$0xff pattern:$0x75316420]  ;;  %v29_v10 = vld.sshfl [vmem:[#allocation1 + $0x8] sm:$0xff pattern:$0x75316420] }
   0xb   :  { %v421_v11 = vpop.eup %420  ;;  %v39_v12 = vsel %vm38_vm0, %v28_v9, 0.0  ;;  %v40_v13 = vsel %vm38_vm0, %v29_v10, 0.0  ;;  %53 = vst [vmem:[#allocation1] ss:$2 sm:$0xff] %v49_v6 }
   0xc   :  { %v423_v15 = vpop.eup %422  ;;  %v144_v16 = vmul.f32 %v421_v11, %v142_v3  ;;  %v41_v17 = vadd.f32 %v40_v13, %v39_v12  ;;  %vm149_vm2 = vweird.f32 %v421_v11 }
   0xd   :  { %v205_v20 = vmul.f32 %v423_v15, %v203_v4  ;;  %v32_v21 = vld.sshfl [vmem:[#allocation1 + $0x10] sm:$0xff pattern:$0x75316420]  ;;  %v33_v22 = vld.sshfl [vmem:[#allocation1 + $0x18] sm:$0xff pattern:$0x75316420]  ;;  %vm210_vm4 = vweird.f32 %v423_v15  ;;  %vm541_vm6 = vmor %vm148_vm1, %vm149_vm2 }
   0xe   :  { %v145_v23 = vsub.f32 1.0, %v144_v16  ;;  %42 = vadd.xlane.f32.xlu1 %v41_v17  ;;  %57 = vst [vmem:[#allocation1 + $0x10] ss:$2 sm:$0xff] %v50_v19  ;;  %vm549_vm8 = vmor %vm209_vm3, %vm210_vm4  ;;  %v44_v39 = vsel %vm38_vm0, %v32_v21, 0.0  ;;  %v45_v42 = vsel %vm38_vm0, %v33_v22, 0.0 }
   0xf   :  { %v206_v24 = vsub.f32 1.0, %v205_v20  ;;  %v46_v45 = vadd.f32 %v45_v42, %v44_v39 }
  0x10   :  { %v146_v25 = vmul.f32 %v421_v11, %v145_v23 }
  0x11   :  { %v207_v29 = vmul.f32 %v423_v15, %v206_v24 }
  0x12   :  { %v147_v32 = vadd.f32 %v421_v11, %v146_v25  ;;  %v54_v33 = vld.sshfl [vmem:[#allocation1] sm:$0xff pattern:$0x75316420]  ;;  %v55_v34 = vld.sshfl [vmem:[#allocation1 + $0x8] sm:$0xff pattern:$0x75316420] }
  0x13   :  { %v64_v36 = vsel %vm38_vm0, %v54_v33, 0.0  ;;  %v65_v37 = vsel %vm38_vm0, %v55_v34, 0.0  ;;  %v208_v38 = vadd.f32 %v423_v15, %v207_v29 }
  0x14   :  { %v151_v40 = vsel %vm541_vm6, %v421_v11, %v147_v32  ;;  %v66_v41 = vadd.f32 %v65_v37, %v64_v36 }
  0x15   :  { %v156_v43 = vsel %vm537_vm5, %v155_v28, %v151_v40  ;;  %v212_v44 = vsel %vm549_vm8, %v423_v15, %v208_v38  ;;  %v58_v46 = vld.sshfl [vmem:[#allocation1 + $0x10] sm:$0xff pattern:$0x75316420]  ;;  %v59_v47 = vld.sshfl [vmem:[#allocation1 + $0x18] sm:$0xff pattern:$0x75316420] }
  0x16   :  { %v158_v48 = vadd.f32 1.0, %v156_v43  ;;  %67 = vadd.xlane.f32.xlu2 %v66_v41  ;;  %v217_v49 = vsel %vm545_vm7, %v216_v31, %v212_v44  ;;  %47 = vadd.xlane.f32.xlu1 %v46_v45  ;;  %v69_v51 = vsel %vm38_vm0, %v58_v46, 0.0  ;;  %v70_v52 = vsel %vm38_vm0, %v59_v47, 0.0 }
  0x17   :  { %v219_v50 = vadd.f32 1.0, %v217_v49  ;;  %v71_v53 = vadd.f32 %v70_v52, %v69_v51 }
  0x18   :  { %424 = vrcp.f32 %v158_v48  ;;  %v170_v57 = vand.u32 2147483648, %v158_v48  ;;  %vm164_vm9 = vweird.f32 %v158_v48  ;;  %v168_v60 = vand.u32 2147483647, %v158_v48 }
  0x19   :  { %426 = vrcp.f32 %v219_v50  ;;  %vm225_vm11 = vweird.f32 %v219_v50  ;;  %v231_v2 = vand.u32 2147483648, %v219_v50  ;;  %v229_v4 = vand.u32 2147483647, %v219_v50 }
  0x1a   :  { %v171_v63 = vor.u32 1.1754944e-38, %v170_v57  ;;  %vm169_vm14 = vcmp.eq.f32.partialorder %v168_v60, 8.507059e+37 }
  0x1b   :  { %v232_v9 = vor.u32 1.1754944e-38, %v231_v2  ;;  %vm230_vm2 = vcmp.eq.f32.partialorder %v229_v4, 8.507059e+37 }
  0x1e   :  { %v425_v54 = vpop.eup %424  ;;  %72 = vadd.xlane.f32.xlu2 %v71_v53 }
  0x1f   :  { %v427_v55 = vpop.eup %426  ;;  %v160_v56 = vmul.f32 %v425_v54, %v158_v48  ;;  %vm165_vm10 = vweird.f32 %v425_v54 }
  0x20   :  { %v221_v58 = vmul.f32 %v427_v55, %v219_v50  ;;  %vm226_vm12 = vweird.f32 %v427_v55  ;;  %vm166_vm13 = vmor %vm164_vm9, %vm165_vm10 }
  0x21   :  { %v161_v59 = vsub.f32 1.0, %v160_v56  ;;  %vm227_vm1 = vmor %vm225_vm11, %vm226_vm12 }
  0x22   :  { %v222_v61 = vsub.f32 1.0, %v221_v58 }
  0x23   :  { %v162_v62 = vmul.f32 %v425_v54, %v161_v59 }
  0x24   :  { %v223_v0 = vmul.f32 %v427_v55, %v222_v61 }
  0x25   :  { %v163_v3 = vadd.f32 %v425_v54, %v162_v62 }
  0x26   :  { %v224_v6 = vadd.f32 %v427_v55, %v223_v0  ;;  %v472_v0 = vmov 2.0  }
  0x27   :  { %v167_v7 = vsel %vm166_vm13, %v425_v54, %v163_v3 }
  0x28   :  { %v567_v8 = vsel %vm169_vm14, %v171_v63, %v167_v7  ;;  %v228_v11 = vsel %vm227_vm1, %v427_v55, %v224_v6 }
  0x29   :  { %v176_v10 = vsel %vm175_vm15, %v567_v8, 0.0  ;;  %v571_v12 = vsel %vm230_vm2, %v232_v9, %v228_v11 }
  0x2a   :  { %177 = vadd.xlane.f32.xlu0 %v176_v10  ;;  %v236_v13 = vsel %vm175_vm15, %v571_v12, 0.0 }
  0x32   :  { %237 = vadd.xlane.f32.xlu0 %v236_v13 }
  0x81   :  { %v43_v14 = vpop.xlane.xlu1 %42 }
  0x82   :  { %v575_v15 = vmul.f32 0.00390625, %v43_v14 }
  0x84   :  { %378 = vst.msk [vmem:[%s693_s6] sm:$0xf] %vm175_vm15, %v575_v15  ;;  %v76_v16 = vmul.f32 %v575_v15, %v43_v14  ;;  %v110_v7 = vsel %vm38_vm0, %v575_v15, 0.0 }
  0x89   :  { %v68_v17 = vpop.xlane.xlu2 %67  ;;  %v48_v19 = vpop.xlane.xlu1 %47 }
  0x8a   :  { %v78_v18 = vsub.f32 %v68_v17, %v76_v16  ;;  %v583_v20 = vmul.f32 0.00390625, %v48_v19  ;;  %v473_v16 = vmov 0  }
  0x8b   :  { %418 = vset.pattern.permute.xlu1 %v473_v16  ;;  %417 = vset.pattern.permute.xlu0 %v473_v16 }
  0x8c   :  { %v80_v21 = vmax.f32 %v78_v18, 0.0  ;;  %379 = vst.msk [vmem:[%s693_s6 + $0x4] sm:$0xf] %vm175_vm15, %v583_v20  ;;  %v77_v23 = vmul.f32 %v583_v20, %v48_v19  ;;  %v111_v9 = vsel %vm38_vm0, %v583_v20, 0.0  ;;  %419 = vset.pattern.permute.xlu2 %v473_v16 }
  0x8d   :  { %v112_v11 = vadd.f32 %v111_v9, %v110_v7 }
  0x8e   :  { %v82_v22 = vmul.f32 0.003921569, %v80_v21 }
  0x90   :  { %v84_v24 = vadd.f32 1e-06, %v82_v22 }
  0x91   :  { %v73_v25 = vpop.xlane.xlu2 %72 }
  0x92   :  { %428 = vrsqrt.f32 %v84_v24  ;;  %v79_v26 = vsub.f32 %v73_v25, %v77_v23  ;;  %vm93_vm3 = vcmp.eq.f32.partialorder %v84_v24, inf  ;;  %v96_v41 = vand.u32 2147483648, %v84_v24 }
  0x93   :  { %vm95_vm4 = vcmp.eq.f32.partialorder %v84_v24, 0.0 }
  0x94   :  { %v81_v27 = vmax.f32 %v79_v26, 0.0 }
  0x96   :  { %v83_v28 = vmul.f32 0.003921569, %v81_v27 }
  0x98   :  { %v429_v29 = vpop.eup %428  ;;  %v85_v31 = vadd.f32 1e-06, %v83_v28 }
  0x99   :  { %v87_v30 = vmul.f32 %v429_v29, %v84_v24 }
  0x9a   :  { %430 = vrsqrt.f32 %v85_v31  ;;  %vm105_vm5 = vcmp.eq.f32.partialorder %v85_v31, inf  ;;  %v108_v57 = vand.u32 2147483648, %v85_v31  ;;  %vm107_vm6 = vcmp.eq.f32.partialorder %v85_v31, 0.0 }
  0x9b   :  { %v88_v32 = vmul.f32 %v429_v29, %v87_v30  ;;  %432 = vrcp.f32 %v472_v0 }
  0x9d   :  { %v178_v33 = vpop.xlane.xlu0 %177  ;;  %v89_v34 = vmul.f32 0.5, %v88_v32 }
  0x9e   :  { %v179_v35 = vrot.slane %v178_v33, 4 }
  0x9f   :  { %v90_v36 = vsub.f32 1.5, %v89_v34 }
  0xa0   :  { %v180_v37 = vadd.f32 %v179_v35, %v178_v33  ;;  %v431_v38 = vpop.eup %430 }
  0xa1   :  { %v91_v39 = vmul.f32 %v429_v29, %v90_v36  ;;  %v99_v42 = vmul.f32 %v431_v38, %v85_v31  ;;  %v433_v2 = vpop.eup %432 }
  0xa2   :  { %v181_v40 = vrot.slane %v180_v37, 2  ;;  %v114_v3 = vmul.f32 2.0, %v433_v2  ;;  %vm118_vm7 = vweird.f32 %v433_v2 }
  0xa3   :  { %v92_v43 = vmul.f32 %v91_v39, %v84_v24  ;;  %v100_v45 = vmul.f32 %v431_v38, %v99_v42 }
  0xa4   :  { %v182_v44 = vadd.f32 %v181_v40, %v180_v37  ;;  %v115_v4 = vsub.f32 1.0, %v114_v3 }
  0xa5   :  { %v94_v46 = vsel %vm93_vm3, %v84_v24, %v92_v43  ;;  %v238_v47 = vpop.xlane.xlu0 %237  ;;  %v101_v51 = vmul.f32 0.5, %v100_v45 }
  0xa6   :  { %v591_v48 = vsel %vm95_vm4, %v96_v41, %v94_v46  ;;  %v239_v49 = vrot.slane %v238_v47, 4  ;;  %v183_v50 = vrot.slane %v182_v44, 1  ;;  %v116_v6 = vmul.f32 %v433_v2, %v115_v4 }
  0xa7   :  { %405 = vst.msk [vmem:[%s693_s6 + $0x8] sm:$0xf] %vm175_vm15, %v591_v48  ;;  %v102_v54 = vsub.f32 1.5, %v101_v51  ;;  %v129_v18 = vsel %vm38_vm0, %v591_v48, 0.0 }
  0xa8   :  { %v240_v52 = vadd.f32 %v239_v49, %v238_v47  ;;  %v184_v53 = vadd.f32 %v183_v50, %v182_v44  ;;  %v117_v10 = vadd.f32 %v433_v2, %v116_v6 }
  0xa9   :  { %v103_v56 = vmul.f32 %v431_v38, %v102_v54  ;;  %v174_v38 = vmul.f32 4.0, %v567_v8 }
  0xaa   :  { %v241_v55 = vrot.slane %v240_v52, 2  ;;  %407 = vpush %v184_v53  ;;  %v119_v13 = vsel %vm118_vm7, %v433_v2, %v117_v10 }
  0xab   :  { %v104_v58 = vmul.f32 %v103_v56, %v85_v31  ;;  %v120_v14 = vmul.f32 %v119_v13, %v112_v11 }
  0xac   :  { %v242_v59 = vadd.f32 %v241_v55, %v240_v52 }
  0xad   :  { %v106_v60 = vsel %vm105_vm5, %v85_v31, %v104_v58  ;;  %v121_v21 = vsub.f32 %v575_v15, %v120_v14  ;;  %v122_v22 = vsub.f32 %v583_v20, %v120_v14 }
  0xae   :  { %v243_v61 = vrot.slane %v242_v59, 1  ;;  %v598_v62 = vsel %vm107_vm6, %v108_v57, %v106_v60  ;;  %v235_v57 = vmul.f32 4.0, %v571_v12 }
  0xaf   :  { %406 = vst.msk [vmem:[%s693_s6 + $0xc] sm:$0xf] %vm175_vm15, %v598_v62  ;;  %v130_v19 = vsel %vm38_vm0, %v598_v62, 0.0  ;;  %v123_v25 = vmul.f32 %v121_v21, %v121_v21  ;;  %v124_v26 = vmul.f32 %v122_v22, %v122_v22  ;;  %vm322_vm2 = vweird.f32 %v598_v62 }
  0xb0   :  { %v244_v63 = vadd.f32 %v243_v61, %v242_v59  ;;  %v131_v23 = vadd.f32 %v130_v19, %v129_v18 }
  0xb1   :  { %v125_v31 = vsel %vm38_vm0, %v123_v25, 0.0  ;;  %v126_v33 = vsel %vm38_vm0, %v124_v26, 0.0 }
  0xb2   :  { %409 = vpush %v244_v63  ;;  %v132_v29 = vmul.f32 %v131_v23, %v119_v13  ;;  %v127_v41 = vadd.f32 %v126_v33, %v125_v31 }
  0xb4   :  { %v133_v36 = vsub.f32 %v591_v48, %v132_v29  ;;  %v134_v37 = vsub.f32 %v598_v62, %v132_v29  ;;  %v128_v51 = vadd.f32 1e-06, %v127_v41 }
  0xb6   :  { %v135_v46 = vmul.f32 %v133_v36, %v133_v36  ;;  %v136_v47 = vmul.f32 %v134_v37, %v134_v37  ;;  %v297_v37 = vld [vmem:[%s689_s2 + $0x4] sm:$0xf] }
  0xb8   :  { %v137_v55 = vsel %vm38_vm0, %v135_v46, 0.0  ;;  %v138_v56 = vsel %vm38_vm0, %v136_v47, 0.0  ;;  %vm307_vm0 = vweird.f32 %v591_v48 }
  0xb9   :  { %v139_v61 = vadd.f32 %v138_v56, %v137_v55 }
  0xbb   :  { %v140_v3 = vadd.f32 1e-06, %v139_v61 }
  0xdb   :  { %s408_s6 = spop %407 }
  0xdc   :  { %v186_v17 = vstv %s408_s6 }
  0xdd   :  { %434 = vrcp.f32 %v186_v17  ;;  %v198_v32 = vand.u32 2147483648, %v186_v17  ;;  %v196_v35 = vand.u32 2147483647, %v186_v17  ;;  %vm192_vm9 = vweird.f32 %v186_v17 }
  0xdf   :  { %v199_v42 = vor.u32 1.1754944e-38, %v198_v32  ;;  %vm197_vm11 = vcmp.eq.f32.partialorder %v196_v35, 8.507059e+37  ;;  %v328_v32 = vand.u32 2147483648, %v598_v62 }
  0xe3   :  { %v435_v24 = vpop.eup %434  ;;  %s410_s10 = spop %409 }
  0xe4   :  { %v188_v27 = vmul.f32 %v435_v24, %v186_v17  ;;  %v246_v28 = vstv %s410_s10  ;;  %vm193_vm8 = vweird.f32 %v435_v24 }
  0xe5   :  { %436 = vrcp.f32 %v246_v28  ;;  %vm194_vm10 = vmor %vm192_vm9, %vm193_vm8  ;;  %v258_v52 = vand.u32 2147483648, %v246_v28  ;;  %v256_v8 = vand.u32 2147483647, %v246_v28  ;;  %vm252_vm13 = vweird.f32 %v246_v28 }
  0xe6   :  { %v189_v30 = vsub.f32 1.0, %v188_v27 }
  0xe7   :  { %v259_v60 = vor.u32 1.1754944e-38, %v258_v52  ;;  %vm257_vm15 = vcmp.eq.f32.partialorder %v256_v8, 8.507059e+37 }
  0xe8   :  { %v190_v34 = vmul.f32 %v435_v24, %v189_v30  ;;  %v311_v30 = vand.u32 2147483647, %v591_v48 }
  0xea   :  { %v191_v39 = vadd.f32 %v435_v24, %v190_v34  ;;  %v313_v34 = vand.u32 2147483648, %v591_v48 }
  0xeb   :  { %v437_v40 = vpop.eup %436 }
  0xec   :  { %v195_v43 = vsel %vm194_vm10, %v435_v24, %v191_v39  ;;  %v248_v44 = vmul.f32 %v437_v40, %v246_v28  ;;  %vm253_vm12 = vweird.f32 %v437_v40  ;;  %v326_v39 = vand.u32 2147483647, %v598_v62 }
  0xed   :  { %v200_v45 = vsel %vm197_vm11, %v199_v42, %v195_v43  ;;  %vm254_vm14 = vmor %vm252_vm13, %vm253_vm12  ;;  %vm660_vm10 = vcmp.eq.f32.partialorder %v311_v30, 8.507059e+37 }
  0xee   :  { %v201_v49 = vmul.f32 %v200_v45, %v174_v38  ;;  %v249_v50 = vsub.f32 1.0, %v248_v44  ;;  %v296_v44 = vld [vmem:[%s689_s2] sm:$0xf]  ;;  %vm327_vm11 = vcmp.eq.f32.partialorder %v326_v39, 8.507059e+37 }
  0xf0   :  { %v262_v53 = vadd.f32 1.0, %v201_v49  ;;  %v250_v54 = vmul.f32 %v437_v40, %v249_v50  ;;  %v290_v49 = vld [vmem:[%s688_s1] sm:$0xf] }
  0xf2   :  { %v623_v58 = vmul.f32 %v262_v53, %v128_v51  ;;  %v251_v59 = vadd.f32 %v437_v40, %v250_v54  ;;  %v329_v51 = vor.u32 1.1754944e-38, %v328_v32  ;;  %v314_v53 = vor.u32 1.1754944e-38, %v313_v34  ;;  %v291_v54 = vld [vmem:[%s688_s1 + $0x4] sm:$0xf]  ;;  %s475_s1 = smov [#allocation2]  }
  0xf3   :  { %s387_s18 = sshll.u32 %s475_s1, 4  ;;  %s388_s18 = int_to_ptr.vmem [resolvable:$true] %s387_s18 }
  0xf4   :  { %v255_v63 = vsel %vm254_vm14, %v437_v40, %v251_v59  ;;  %438 = vrsqrt.f32 %v623_v58  ;;  %vm271_vm4 = vcmp.eq.f32.partialorder %v623_v58, inf  ;;  %v274_v41 = vand.u32 2147483648, %v623_v58 }
  0xf5   :  { %v260_v0 = vsel %vm257_vm15, %v259_v60, %v255_v63  ;;  %440 = vrcp.f32 %v591_v48  ;;  %vm273_vm8 = vcmp.eq.f32.partialorder %v623_v58, 0.0 }
  0xf6   :  { %v261_v2 = vmul.f32 %v260_v0, %v235_v57  ;;  %442 = vrcp.f32 %v598_v62 }
  0xf8   :  { %v276_v4 = vadd.f32 1.0, %v261_v2 }
  0xfa   :  { %v439_v12 = vpop.eup %438  ;;  %v277_v6 = vmul.f32 %v276_v4, %v140_v3 }
  0xfb   :  { %v265_v7 = vmul.f32 %v439_v12, %v623_v58  ;;  %v441_v9 = vpop.eup %440 }
  0xfc   :  { %444 = vrsqrt.f32 %v277_v6  ;;  %v443_v11 = vpop.eup %442  ;;  %v303_v14 = vmul.f32 %v441_v9, %v591_v48  ;;  %vm308_vm1 = vweird.f32 %v441_v9  ;;  %vm285_vm6 = vcmp.eq.f32.partialorder %v277_v6, inf }
  0xfd   :  { %v266_v10 = vmul.f32 %v439_v12, %v265_v7  ;;  %v318_v16 = vmul.f32 %v443_v11, %v598_v62  ;;  %vm323_vm3 = vweird.f32 %v443_v11  ;;  %vm645_vm5 = vmor %vm307_vm0, %vm308_vm1  ;;  %v288_v42 = vand.u32 2147483648, %v277_v6 }
  0xfe   :  { %v304_v21 = vsub.f32 1.0, %v303_v14  ;;  %vm652_vm7 = vmor %vm322_vm2, %vm323_vm3  ;;  %vm287_vm9 = vcmp.eq.f32.partialorder %v277_v6, 0.0 }
  0xff   :  { %v267_v13 = vmul.f32 0.5, %v266_v10  ;;  %v319_v24 = vsub.f32 1.0, %v318_v16 }
 0x100   :  { %v305_v26 = vmul.f32 %v441_v9, %v304_v21 }
 0x101   :  { %v268_v17 = vsub.f32 1.5, %v267_v13  ;;  %v320_v29 = vmul.f32 %v443_v11, %v319_v24 }
 0x102   :  { %v445_v18 = vpop.eup %444  ;;  %v306_v33 = vadd.f32 %v441_v9, %v305_v26 }
 0x103   :  { %v279_v19 = vmul.f32 %v445_v18, %v277_v6  ;;  %v269_v22 = vmul.f32 %v439_v12, %v268_v17  ;;  %v321_v38 = vadd.f32 %v443_v11, %v320_v29 }
 0x104   :  { %v310_v52 = vsel %vm645_vm5, %v441_v9, %v306_v33  ;;  %v474_v9 = vmov 839922192  }
 0x105   :  { %v280_v23 = vmul.f32 %v445_v18, %v279_v19  ;;  %v270_v27 = vmul.f32 %v269_v22, %v623_v58  ;;  %v325_v55 = vsel %vm652_vm7, %v443_v11, %v321_v38  ;;  %v315_v63 = vsel %vm660_vm10, %v314_v53, %v310_v52 }
 0x106   :  { %v330_v61 = vsel %vm327_vm11, %v329_v51, %v325_v55  ;;  %v345_v10 = vunpack.c.l.s4 %v474_v9 }
 0x107   :  { %v281_v25 = vmul.f32 0.5, %v280_v23  ;;  %v272_v35 = vsel %vm271_vm4, %v623_v58, %v270_v27 }
 0x108   :  { %v275_v47 = vsel %vm273_vm8, %v274_v41, %v272_v35  ;;  %v346_v11 = vunpack.c.0.s8 %v345_v10 }
 0x109   :  { %v282_v28 = vsub.f32 1.5, %v281_v25  ;;  %v292_v57 = vmul.f32 %v290_v49, %v275_v47  ;;  %v293_v60 = vmul.f32 %v291_v54, %v275_v47 }
 0x10b   :  { %v283_v31 = vmul.f32 %v445_v18, %v282_v28  ;;  %v294_v3 = vadd.f32 %v292_v57, %v575_v15  ;;  %v295_v12 = vadd.f32 %v293_v60, %v583_v20 }
 0x10d   :  { %v284_v36 = vmul.f32 %v283_v31, %v277_v6 }
 0x10f   :  { %v286_v45 = vsel %vm285_vm6, %v277_v6, %v284_v36 }
 0x110   :  { %v289_v50 = vsel %vm287_vm9, %v288_v42, %v286_v45 }
 0x111   :  { %v299_v8 = vmul.f32 %v297_v37, %v289_v50  ;;  %v298_v56 = vmul.f32 %v296_v44, %v289_v50 }
 0x113   :  { %v301_v58 = vadd.f32 %v299_v8, %v598_v62  ;;  %v300_v59 = vadd.f32 %v298_v56, %v591_v48 }
 0x115   :  { %v331_v0 = vmul.f32 %v330_v61, %v301_v58  ;;  %v316_v2 = vmul.f32 %v315_v63, %v300_v59 }
 0x117   :  { %342 = vperm.xlu1 %418, %v331_v0   ;;  %338 = vperm.xlu0 %417, %v316_v2   ;;  %v332_v4 = vmul.f32 %v316_v2, %v575_v15  ;;  %v333_v6 = vmul.f32 %v331_v0, %v583_v20 }
 0x119   :  { %v334_v62 = vsub.f32 %v294_v3, %v332_v4  ;;  %v335_v7 = vsub.f32 %v295_v12, %v333_v6 }
 0x11b   :  { %358 = vperm.xlu2 %419, %v334_v62  }
 0x123   :  { %362 = vperm.xlu2 %419, %v335_v7  }
 0x175   :  { %v359_v48 = vpop.permute.xlu2 %358 }
 0x176   :  { %v367_v15 = vperm.slane %v359_v48, %v346_v11 }
 0x17d   :  { %v363_v13 = vpop.permute.xlu2 %362 }
 0x17e   :  { %v371_v20 = vperm.slane %v363_v13, %v346_v11 }
 0x189   :  { %v343_v14 = vpop.permute.xlu1 %342  ;;  %v339_v16 = vpop.permute.xlu0 %338 }
 0x18a   :  { %v351_v17 = vperm.slane %v343_v14, %v346_v11  ;;  %v347_v18 = vperm.slane %v339_v16, %v346_v11 }
 0x18c   :  { %v355_v19 = vmul.f32 %v351_v17, %v528_v5  ;;  %v354_v21 = vmul.f32 %v347_v18, %v519_v1 }
 0x18e   :  { %v375_v22 = vadd.f32 %v371_v20, %v355_v19  ;;  %v374_v23 = vadd.f32 %v367_v15, %v354_v21 }
 0x190   :  { %377 = vst [vmem:[#allocation2 + $0x8] sm:$0xff] %v375_v22 }
 0x191   :  { %376 = vst [vmem:[#allocation2] sm:$0xff] %v374_v23 }
 0x192   :  { %395 = dma.vmem_to_hbm [thread:$0]  %s388_s18, 256, %s390_s21, [#allocation3], %s476_s22, %s476_s22, %s477_s23  }
 0x193   :  { %470 = dma.done.wait [#allocation3], 256  }
 0x194   :  { %471 = vsyncadd [#allocation3], 4294967040 }
 0x195   :  { %404 = vsyncpa [#allocation3], 1 }

</bundles_post_ra>
